<compile_context>
chip_gen: v5e
topology: v5e:2x2
jax: 0.10.0
libtpu: 0.0.40
codegen_flags: <defaults>
</compile_context>

<pallas_src>
import functools

import jax
import jax.numpy as jnp
from jax.experimental import pallas as pl
from jax.experimental.pallas import tpu as pltpu

_LANES = 128
_CHUNK_GROUP = 8          # chunks folded in vregs per accumulator update
_SINGLE_BLOCK_MAX = 4096  # max lane-padded HW handled with a single k block


def _round_up(v, m):
    return ((v + m - 1) // m) * m


def _fold_chunks(x_ref, chunk_ids, base, hw_total, masked):
    """Fold 128-lane chunks of x_ref into lane-dense f32 partial sum/max.

    Pure VALU (elementwise add / max) on aligned static lane slices; no
    cross-lane work, no full-block temporaries.  Returns (sum_part, max_part),
    each shaped (rows, 128) float32.
    """
    ps = None
    pm = None
    for c in chunk_ids:
        lo = c * _LANES
        x = x_ref[:, lo:lo + _LANES].astype(jnp.float32)
        if masked and (base + lo + _LANES > hw_total):
            # Statically-identified tail chunk: mask lanes past the true HW.
            lane = jax.lax.broadcasted_iota(jnp.int32, (1, _LANES), 1)
            valid = (base + lo + lane) < hw_total
            xs = jnp.where(valid, x, 0.0)
            xm = jnp.where(valid, x, -jnp.inf)
        else:
            xs = x
            xm = x
        ps = xs if ps is None else ps + xs
        pm = xm if pm is None else jnp.maximum(pm, xm)
    return ps, pm


def _concat_pool_kernel(x_ref, avg_ref, max_ref, *scratch, hw_total, hw_tile,
                        k_blocks, needs_mask):
    """Global avg+max pool over the lane axis of one (row_tile, hw_tile) block."""
    n_chunks = hw_tile // _LANES
    inv_hw = 1.0 / float(hw_total)

    if k_blocks == 1:
        # Whole HW extent in one block: fold in vregs, one XLU reduce, store.
        ps, pm = _fold_chunks(x_ref, range(n_chunks), 0, hw_total, needs_mask)
        avg_ref[...] = (jnp.sum(ps, axis=-1, keepdims=True) * inv_hw).astype(avg_ref.dtype)
        max_ref[...] = jnp.max(pm, axis=-1, keepdims=True).astype(max_ref.dtype)
        return

    sum_sc, max_sc = scratch
    k = pl.program_id(1)
    last_k = k_blocks - 1

    @pl.when(k == 0)
    def _init():
        sum_sc[...] = jnp.zeros_like(sum_sc)
        max_sc[...] = jnp.full_like(max_sc, -jnp.inf)

    def accumulate(chunk_ids, base, masked):
        # Fold chunks in groups so the lane-dense VMEM accumulators see one
        # read-modify-write per group instead of per chunk (vld/vst pressure).
        chunk_ids = list(chunk_ids)
        for g0 in range(0, len(chunk_ids), _CHUNK_GROUP):
            grp = chunk_ids[g0:g0 + _CHUNK_GROUP]
            ps, pm = _fold_chunks(x_ref, grp, base, hw_total, masked)
            sum_sc[...] = sum_sc[...] + ps
            max_sc[...] = jnp.maximum(max_sc[...], pm)

    if needs_mask:
        @pl.when(k != last_k)
        def _body():
            accumulate(range(n_chunks), 0, False)

        @pl.when(k == last_k)
        def _tail():
            base = last_k * hw_tile
            # Chunks entirely past HW are skipped statically.
            live = [c for c in range(n_chunks) if base + c * _LANES < hw_total]
            accumulate(live, base, True)
    else:
        accumulate(range(n_chunks), 0, False)

    @pl.when(k == last_k)
    def _finalize():
        # One cross-lane (XLU) reduce per output, once per row block.
        total = jnp.sum(sum_sc[...], axis=-1, keepdims=True)
        mx = jnp.max(max_sc[...], axis=-1, keepdims=True)
        avg_ref[...] = (total * inv_hw).astype(avg_ref.dtype)
        max_ref[...] = mx.astype(max_ref.dtype)


def _choose_tiles(nc, hw, dtype):
    """Pick (row_tile, hw_tile, k_blocks, needs_mask, vmem_limit_bytes)."""
    in_bytes = jnp.dtype(dtype).itemsize
    out_bytes = in_bytes
    sub = max(8, 32 // max(1, in_bytes))      # sublane packing: 8 f32, 16 bf16, 32 int8
    hw_lanes = _round_up(hw, _LANES)

    if hw_lanes <= _SINGLE_BLOCK_MAX:
        # Single k block: round up to a lane multiple and mask the tail.
        hw_tile = hw_lanes
        k_blocks = 1
    else:
        hw_tile = 2048
        k_blocks = -(-hw // hw_tile)
    needs_mask = (k_blocks * hw_tile) > hw

    # Accurate per-row VMEM bytes: lane-padded double-buffered input block,
    # two f32 lane-dense accumulators, two lane-padded double-buffered
    # (row_tile, 1) outputs, plus headroom for the in-flight f32 partials.
    per_row = (2 * hw_tile * in_bytes
               + 2 * _LANES * 4
               + 2 * 2 * _LANES * out_bytes
               + 2 * _LANES * 4)
    target = 28 * 1024 * 1024
    rt = max(1, target // per_row)
    rt = max(sub, (rt // sub) * sub)
    # Keep >= 2 row blocks when NC allows it: the "parallel" row axis shards
    # across v7x's two TensorCores; on 1-TC v5e/v6e this costs ~one grid step.
    rt = min(rt, max(sub, _round_up(-(-nc // 2), sub)))
    rt = min(rt, _round_up(nc, sub))

    vmem_bytes = rt * per_row
    vmem_limit = int(min(48 * 1024 * 1024,
                         max(16 * 1024 * 1024, vmem_bytes + 4 * 1024 * 1024)))
    return rt, hw_tile, k_blocks, needs_mask, vmem_limit


def adaptive_concat_pool2d(x):
    """AdaptiveConcatPool2d(output_size=1): (N, C, H, W) -> (N, 2*C, 1, 1)."""
    N, C, H, W = x.shape
    NC, HW = N * C, H * W
    x_flat = x.reshape(NC, HW)

    row_tile, hw_tile, k_blocks, needs_mask, vmem_limit = _choose_tiles(NC, HW, x.dtype)
    r_blocks = -(-NC // row_tile)               # ragged last row block: no pad

    kernel = functools.partial(
        _concat_pool_kernel,
        hw_total=HW, hw_tile=hw_tile, k_blocks=k_blocks, needs_mask=needs_mask)

    scratch_shapes = []
    if k_blocks > 1:
        scratch_shapes = [
            pltpu.VMEM((row_tile, _LANES), jnp.float32),   # lane-dense running sum
            pltpu.VMEM((row_tile, _LANES), jnp.float32),   # lane-dense running max
        ]

    avg_flat, max_flat = pl.pallas_call(
        kernel,
        out_shape=(
            jax.ShapeDtypeStruct((NC, 1), x.dtype),
            jax.ShapeDtypeStruct((NC, 1), x.dtype),
        ),
        grid=(r_blocks, k_blocks),
        in_specs=[pl.BlockSpec((row_tile, hw_tile), lambda r, k: (r, k))],
        out_specs=(
            pl.BlockSpec((row_tile, 1), lambda r, k: (r, 0)),
            pl.BlockSpec((row_tile, 1), lambda r, k: (r, 0)),
        ),
        scratch_shapes=scratch_shapes,
        compiler_params=pltpu.CompilerParams(
            dimension_semantics=("parallel", "arbitrary"),
            vmem_limit_bytes=vmem_limit),
    )(x_flat)

    avg = avg_flat.reshape(N, C, 1, 1)
    mx = max_flat.reshape(N, C, 1, 1)
    # torch.cat((avg_pool, max_pool), dim=1)
    return jnp.concatenate([avg, mx], axis=1)


if __name__ == "__main__":
    key = jax.random.PRNGKey(0)
    N, C, H, W = 2, 4, 16, 16
    x = jax.random.normal(key, (N, C, H, W), dtype=jnp.float32)

    out = adaptive_concat_pool2d(x)
    out = jax.block_until_ready(out)

    # Reference check against plain JAX.
    ref = jnp.concatenate(
        [jnp.mean(x, axis=(2, 3), keepdims=True),
         jnp.max(x, axis=(2, 3), keepdims=True)], axis=1)
    assert out.shape == (N, 2 * C, 1, 1)
    assert jnp.allclose(out, ref, atol=1e-5, rtol=1e-5)

    print("KERNEL_OK")
</pallas_src>

<mosaic_0001>
module attributes {stable_mosaic.version = 11 : i64} {
  func.func @_concat_pool_kernel(%arg0: i32, %arg1: i32, %arg2: memref<8x256xf32, #tpu.memory_space<vmem>>, %arg3: memref<8x1xf32, #tpu.memory_space<vmem>>, %arg4: memref<8x1xf32, #tpu.memory_space<vmem>>) attributes {dimension_semantics = [#tpu.dimension_semantics<parallel>, #tpu.dimension_semantics<arbitrary>], iteration_bounds = array<i64: 1, 1>, scalar_prefetch = 0 : i64, scratch_operands = 0 : i64, tpu.core_type = #tpu.core_type<tc>, window_params = [{transform_indices = @transform_0, window_bounds = array<i64: 8, 256>}, {transform_indices = @transform_1, window_bounds = array<i64: 8, 1>}, {transform_indices = @transform_2, window_bounds = array<i64: 8, 1>}]} {
    %c0 = arith.constant 0 : index
    %c0_0 = arith.constant 0 : index
    %0 = vector.load %arg2[%c0, %c0_0] : memref<8x256xf32, #tpu.memory_space<vmem>>, vector<8x128xf32>
    %c0_1 = arith.constant 0 : index
    %c128 = arith.constant 128 : index
    %1 = vector.load %arg2[%c0_1, %c128] : memref<8x256xf32, #tpu.memory_space<vmem>>, vector<8x128xf32>
    %2 = arith.addf %0, %1 : vector<8x128xf32>
    %3 = arith.maximumf %0, %1 : vector<8x128xf32>
    %cst = arith.constant dense<0.000000e+00> : vector<8xf32>
    %4 = vector.multi_reduction <add>, %2, %cst [1] : vector<8x128xf32> to vector<8xf32>
    %5 = vector.shape_cast %4 : vector<8xf32> to vector<8x1xf32>
    %cst_2 = arith.constant 3.906250e-03 : f32
    %6 = vector.broadcast %cst_2 : f32 to vector<8x1xf32>
    %7 = arith.mulf %5, %6 : vector<8x1xf32>
    %c0_3 = arith.constant 0 : index
    %c0_4 = arith.constant 0 : index
    %8 = vector.load %arg3[%c0_3, %c0_4] : memref<8x1xf32, #tpu.memory_space<vmem>>, vector<8x1xf32>
    tpu.vector_store %arg3[%c0_3, %c0_4], %7 {strides = array<i32>} : memref<8x1xf32, #tpu.memory_space<vmem>>, vector<8x1xf32>,
    %cst_5 = arith.constant dense<0xFF800000> : vector<8xf32>
    %9 = vector.multi_reduction <maximumf>, %3, %cst_5 [1] : vector<8x128xf32> to vector<8xf32>
    %10 = vector.shape_cast %9 : vector<8xf32> to vector<8x1xf32>
    %c0_6 = arith.constant 0 : index
    %c0_7 = arith.constant 0 : index
    %11 = vector.load %arg4[%c0_6, %c0_7] : memref<8x1xf32, #tpu.memory_space<vmem>>, vector<8x1xf32>
    tpu.vector_store %arg4[%c0_6, %c0_7], %10 {strides = array<i32>} : memref<8x1xf32, #tpu.memory_space<vmem>>, vector<8x1xf32>,
    return
  }
  func.func @transform_0(%arg0: i32, %arg1: i32) -> (i32, i32) {
    %c0_i32 = arith.constant 0 : i32
    return %arg0, %arg1 : i32, i32
  }
  func.func @transform_1(%arg0: i32, %arg1: i32) -> (i32, i32) {
    %c0_i32 = arith.constant 0 : i32
    %c0_i32_0 = arith.constant 0 : i32
    return %arg0, %c0_i32 : i32, i32
  }
  func.func @transform_2(%arg0: i32, %arg1: i32) -> (i32, i32) {
    %c0_i32 = arith.constant 0 : i32
    %c0_i32_0 = arith.constant 0 : i32
    return %arg0, %c0_i32 : i32, i32
  }
}

</mosaic_0001>

<bundles_post_ra>
// kernel: tpu_custom_call.1
= control target key start
LH: loop header
LB: loop body
LE: loop exit
PB: predicated region body
PF: predicated region fallthrough
CT: control target
= control target key end

     0   :  { %8 = vsyncpa [#allocation3], 0  ;;  %s72_s12 = smov [#allocation2]   ;;  %s97_s0 = inlined_call_operand.hbm [shape: f32[8,256], index: 0, kind: input, shape index: {}]   ;;  %s98_s1 = inlined_call_operand.vmem [shape: f32[8,1], index: 1, kind: output, shape index: {0}]   ;;  %s99_s2 = inlined_call_operand.vmem [shape: f32[8,1], index: 2, kind: output, shape index: {1}]  }
   0x1   :  { %s14_s11 = sshll.u32 %s97_s0, 4  ;;  %s16_s13 = sshll.u32 %s72_s12, 4  ;;  %s15_s11 = int_to_ptr.hbm [resolvable:$true] %s14_s11  ;;  %s17_s13 = int_to_ptr.vmem [resolvable:$true] %s16_s13 }
   0x2   :  { %19 = dma.hbm_to_vmem [thread:$0]  %s15_s11, 256, %s17_s13, [#allocation3]  }
   0x3   :  { %70 = dma.done.wait [#allocation3], 256  }
   0x4   :  { %71 = vsyncadd [#allocation3], 4294967040  ;;  %v24_v0 = vld [vmem:[#allocation2] sm:$0xff]  ;;  %v25_v1 = vld [vmem:[#allocation2 + $0x8] sm:$0xff]  ;;  %vm31_vm0 = vcmask 7168  }
   0x5   :  { %v26_v2 = vadd.f32 %v25_v1, %v24_v0  ;;  %v27_v3 = vmax.f32 %v24_v0, %v25_v1 }
   0x7   :  { %28 = vadd.xlane.f32.xlu0 %v26_v2 }
   0xf   :  { %33 = vmax.xlane.f32.xlu0 %v27_v3 }
  0x7a   :  { %v29_v4 = vpop.xlane.xlu0 %28 }
  0x7b   :  { %v30_v5 = vmul.f32 0.00390625, %v29_v4 }
  0x7d   :  { %32 = vst.msk [vmem:[%s98_s1] sm:$0xff] %vm31_vm0, %v30_v5 }
  0x82   :  { %v34_v6 = vpop.xlane.xlu0 %33 }
  0x83   :  { %35 = vst.msk [vmem:[%s99_s2] sm:$0xff] %vm31_vm0, %v34_v6 }
  0x84   :  { %44 = vsyncpa [#allocation3], 1 }

</bundles_post_ra>
